<compile_context>
chip_gen: v6e
topology: v6e:2x2x1
jax: 0.10.0
libtpu: 0.0.40
codegen_flags: <defaults>
</compile_context>

<pallas_src>
import jax
import jax.numpy as jnp
from jax import lax
from jax.experimental import pallas as pl
from jax.experimental.pallas import tpu as pltpu


def _round_up(x, m):
    return ((x + m - 1) // m) * m


def slp_kernel(x_ref, w_ref, b_ref, o_ref, acc_ref):
    k = pl.program_id(1)

    @pl.when(k == 0)
    def _():
        acc_ref[...] = jnp.zeros_like(acc_ref)

    # [9, tm] += w[9, tk] . x[tm, tk]  (contract K with K) on the MXU, f32 acc.
    acc_ref[...] += lax.dot_general(
        w_ref[...], x_ref[...],
        dimension_numbers=(((1,), (1,)), ((), ())),
        preferred_element_type=jnp.float32,
    )

    @pl.when(k == pl.num_programs(1) - 1)
    def _():
        # bias [9, 1] broadcasts across the lane (batch) axis.
        o_ref[...] = (acc_ref[...] + b_ref[...]).astype(o_ref.dtype)


def _choose_tiles(B, K):
    # Batch tile: multiple of 128 (lane-dense transposed output, (8,128) rule),
    # capped at 512 and at the padded batch size.
    tm = min(512, _round_up(B, 128))
    # K tile: split K into near-equal chunks, each a multiple of 128, keeping
    # double-buffered f32 x tiles within ~8 MiB of VMEM.
    max_tk = max(128, ((8 << 20) // (2 * tm * 4)) // 128 * 128)
    n_k = pl.cdiv(K, max_tk)
    tk = _round_up(pl.cdiv(K, n_k), 128)
    return tm, tk, n_k


def single_layer_perceptron(x, weight, bias, width):
    """x: [B, width, 384] f32; weight: [9, 384*width] (PyTorch layout); bias: [9]."""
    B = x.shape[0]
    K = 384 * width
    N = weight.shape[0]  # 9

    # Layout plumbing in plain JAX (matches PyTorch's C-order reshape).
    x2d = x.reshape(B, K)
    b2d = bias.reshape(N, 1).astype(jnp.float32)

    tm, tk, n_k = _choose_tiles(B, K)
    Bp = _round_up(B, tm)
    Kp = n_k * tk

    if Bp != B or Kp != K:
        x2d = jnp.pad(x2d, ((0, Bp - B), (0, Kp - K)))
    w2d = jnp.pad(weight, ((0, 0), (0, Kp - K))) if Kp != K else weight

    out_t = pl.pallas_call(
        slp_kernel,
        out_shape=jax.ShapeDtypeStruct((N, Bp), jnp.float32),
        grid_spec=pltpu.PrefetchScalarGridSpec(
            num_scalar_prefetch=0,
            grid=(Bp // tm, n_k),
            in_specs=[
                pl.BlockSpec((tm, tk), lambda i, k: (i, k)),  # x tile (pipelined)
                pl.BlockSpec((N, tk), lambda i, k: (0, k)),   # weight K-slice, lane-dense
                pl.BlockSpec((N, 1), lambda i, k: (0, 0)),    # bias
            ],
            out_specs=pl.BlockSpec((N, tm), lambda i, k: (0, i)),  # lane-dense slab
            scratch_shapes=[pltpu.VMEM((N, tm), jnp.float32)],     # f32 accumulator
        ),
        compiler_params=pltpu.CompilerParams(
            dimension_semantics=("parallel", "arbitrary")),
        cost_estimate=pl.CostEstimate(
            flops=2 * Bp * Kp * N,
            transcendentals=0,
            bytes_accessed=4 * (Bp * Kp + N * Kp + N * Bp),
        ),
    )(x2d, w2d, b2d)

    # Back to the PyTorch output layout [B, 9]; drop batch padding.
    return out_t[:, :B].T


if __name__ == "__main__":
    width = 1
    B = 2
    K = 384 * width

    key = jax.random.PRNGKey(0)
    kx, kw, kb = jax.random.split(key, 3)

    # Deterministic parameter init (PyTorch Linear-style uniform bound).
    bound = 1.0 / jnp.sqrt(jnp.float32(K))
    weight = jax.random.uniform(kw, (9, K), jnp.float32, -bound, bound)
    bias = jax.random.uniform(kb, (9,), jnp.float32, -bound, bound)

    # Input consistent with the forward: [B, width, 384]
    x = jax.random.normal(kx, (B, width, 384), jnp.float32)

    out = single_layer_perceptron(x, weight, bias, width)
    out = jax.block_until_ready(out)

    # Reference check in plain JAX.
    ref = x.reshape(B, K) @ weight.T + bias
    assert out.shape == (B, 9)
    assert jnp.allclose(out, ref, atol=1e-5, rtol=1e-5)

    print("KERNEL_OK")
</pallas_src>

<mosaic_0001>
module attributes {stable_mosaic.version = 11 : i64} {
  func.func @slp_kernel(%arg0: i32, %arg1: i32, %arg2: memref<128x384xf32, #tpu.memory_space<vmem>>, %arg3: memref<9x384xf32, #tpu.memory_space<vmem>>, %arg4: memref<9x1xf32, #tpu.memory_space<vmem>>, %arg5: memref<9x128xf32, #tpu.memory_space<vmem>>, %arg6: memref<9x128xf32, #tpu.memory_space<vmem>>) attributes {dimension_semantics = [#tpu.dimension_semantics<parallel>, #tpu.dimension_semantics<arbitrary>], iteration_bounds = array<i64: 1, 1>, scalar_prefetch = 0 : i64, scratch_operands = 1 : i64, tpu.core_type = #tpu.core_type<tc>, window_params = [{transform_indices = @transform_0, window_bounds = array<i64: 128, 384>}, {transform_indices = @transform_1, window_bounds = array<i64: 9, 384>}, {pipeline_mode = #tpu.pipeline_mode<synchronous>, transform_indices = @transform_2, window_bounds = array<i64: 9, 1>}, {transform_indices = @transform_3, window_bounds = array<i64: 9, 128>}]} {
    %c0_i32 = arith.constant 0 : i32
    %0 = arith.cmpi eq, %arg1, %c0_i32 : i32
    %1 = arith.extui %0 : i1 to i32
    %c0_i32_0 = arith.constant 0 : i32
    %2 = arith.cmpi ne, %1, %c0_i32_0 : i32
    scf.if %2 {
      %cst_10 = arith.constant 0.000000e+00 : f32
      %12 = vector.broadcast %cst_10 : f32 to vector<9x128xf32>
      %c0_11 = arith.constant 0 : index
      %c0_12 = arith.constant 0 : index
      %13 = vector.load %arg6[%c0_11, %c0_12] : memref<9x128xf32, #tpu.memory_space<vmem>>, vector<9x128xf32>
      tpu.vector_store %arg6[%c0_11, %c0_12], %12 {strides = array<i32>} : memref<9x128xf32, #tpu.memory_space<vmem>>, vector<9x128xf32>,
    } else {
    }
    %c0 = arith.constant 0 : index
    %c0_1 = arith.constant 0 : index
    %3 = vector.load %arg6[%c0, %c0_1] : memref<9x128xf32, #tpu.memory_space<vmem>>, vector<9x128xf32>
    %c0_2 = arith.constant 0 : index
    %c0_3 = arith.constant 0 : index
    %4 = vector.load %arg3[%c0_2, %c0_3] : memref<9x384xf32, #tpu.memory_space<vmem>>, vector<9x384xf32>
    %c0_4 = arith.constant 0 : index
    %c0_5 = arith.constant 0 : index
    %5 = vector.load %arg2[%c0_4, %c0_5] : memref<128x384xf32, #tpu.memory_space<vmem>>, vector<128x384xf32>
    %cst = arith.constant dense<0.000000e+00> : vector<9x128xf32>
    %6 = tpu.matmul %4, %5, %cst {dimension_numbers = #tpu.dot_dimension_numbers<[1], [1], [0], [0], [0, 0, 1, 0], [], []>} : vector<9x384xf32>, vector<128x384xf32>, vector<9x128xf32> -> vector<9x128xf32>
    %7 = arith.addf %3, %6 : vector<9x128xf32>
    %c0_6 = arith.constant 0 : index
    %c0_7 = arith.constant 0 : index
    %8 = vector.load %arg6[%c0_6, %c0_7] : memref<9x128xf32, #tpu.memory_space<vmem>>, vector<9x128xf32>
    tpu.vector_store %arg6[%c0_6, %c0_7], %7 {strides = array<i32>} : memref<9x128xf32, #tpu.memory_space<vmem>>, vector<9x128xf32>,
    %c0_i32_8 = arith.constant 0 : i32
    %9 = arith.cmpi eq, %arg1, %c0_i32_8 : i32
    %10 = arith.extui %9 : i1 to i32
    %c0_i32_9 = arith.constant 0 : i32
    %11 = arith.cmpi ne, %10, %c0_i32_9 : i32
    scf.if %11 {
      %c0_10 = arith.constant 0 : index
      %c0_11 = arith.constant 0 : index
      %12 = vector.load %arg6[%c0_10, %c0_11] : memref<9x128xf32, #tpu.memory_space<vmem>>, vector<9x128xf32>
      %c0_12 = arith.constant 0 : index
      %c0_13 = arith.constant 0 : index
      %13 = vector.load %arg4[%c0_12, %c0_13] : memref<9x1xf32, #tpu.memory_space<vmem>>, vector<9x1xf32>
      %14 = vector.broadcast %13 : vector<9x1xf32> to vector<9x128xf32>
      %15 = arith.addf %12, %14 : vector<9x128xf32>
      %c0_14 = arith.constant 0 : index
      %c0_15 = arith.constant 0 : index
      %16 = vector.load %arg5[%c0_14, %c0_15] : memref<9x128xf32, #tpu.memory_space<vmem>>, vector<9x128xf32>
      tpu.vector_store %arg5[%c0_14, %c0_15], %15 {strides = array<i32>} : memref<9x128xf32, #tpu.memory_space<vmem>>, vector<9x128xf32>,
    } else {
    }
    return
  }
  func.func @transform_0(%arg0: i32, %arg1: i32) -> (i32, i32) {
    %c0_i32 = arith.constant 0 : i32
    return %arg0, %arg1 : i32, i32
  }
  func.func @transform_1(%arg0: i32, %arg1: i32) -> (i32, i32) {
    %c0_i32 = arith.constant 0 : i32
    %c0_i32_0 = arith.constant 0 : i32
    return %c0_i32, %arg1 : i32, i32
  }
  func.func @transform_2(%arg0: i32, %arg1: i32) -> (i32, i32) {
    %c0_i32 = arith.constant 0 : i32
    %c0_i32_0 = arith.constant 0 : i32
    %c0_i32_1 = arith.constant 0 : i32
    return %c0_i32, %c0_i32_0 : i32, i32
  }
  func.func @transform_3(%arg0: i32, %arg1: i32) -> (i32, i32) {
    %c0_i32 = arith.constant 0 : i32
    %c0_i32_0 = arith.constant 0 : i32
    return %c0_i32, %arg0 : i32, i32
  }
}

</mosaic_0001>

<bundles_post_ra>
// kernel: tpu_custom_call.1
= control target key start
LH: loop header
LB: loop body
LE: loop exit
PB: predicated region body
PF: predicated region fallthrough
CT: control target
= control target key end

     0   :  { %8 = vsyncpa [#allocation4], 0  ;;  %s471_s0 = inlined_call_operand.hbm [shape: f32[128,384], index: 0, kind: input, shape index: {}]   ;;  %s472_s1 = inlined_call_operand.hbm [shape: f32[9,384], index: 1, kind: input, shape index: {}]   ;;  %s473_s2 = inlined_call_operand.vmem [shape: f32[9,1], index: 2, kind: input, shape index: {}]   ;;  %s474_s3 = inlined_call_operand.hbm [shape: f32[9,128], index: 3, kind: output, shape index: {}]  }
   0x1   :  { %9 = vsyncpa [#allocation7], 0 }
   0x2   :  { %10 = vsyncpa [#allocation5], 0  ;;  %s427_s12 = smov [#allocation3]  }
   0x3   :  { %s16_s13 = sshll.u32 %s427_s12, 4  ;;  %s17_s13 = int_to_ptr.vmem [resolvable:$true] %s16_s13 }
   0x4   :  { %s369_s14 = scalar_lea.vmem %s17_s13, 6144  ;;  %p374_p1 = scmp.lt.s32.totalorder %s17_s13, %s17_s13 }
   0x5   :  { %p370_p0 = scmp.ne.s32.totalorder %s17_s13, %s369_s14  ;;  %p375_p2 = scmp.lt.s32.totalorder %s369_s14, %s369_s14 }
   0x7   :  { %p376_p3 = por %p375_p2, %p374_p1 }
   0x9   :  { %p377_p4 = pnand %p376_p3, %p370_p0 }
   0xb   :  { %380 = shalt.err (!%p377_p4)
}
   0xc   :  { %s428_s15 = smov 384   ;;  %s429_s16 = smov 24  }
   0xd   :  { %22 = dma.hbm_to_vmem [thread:$0]  %s471_s0, 6144, %s17_s13, [#allocation4], %s428_s15, %s428_s15, %s429_s16  }
   0xe   :  { %s430_s19 = smov [#allocation6]  }
   0xf   :  { %s28_s20 = sshll.u32 %s430_s19, 4  ;;  %s29_s20 = int_to_ptr.vmem [resolvable:$true] %s28_s20 }
  0x10   :  { %s389_s21 = scalar_lea.vmem %s29_s20, 768  ;;  %p394_p6 = scmp.lt.s32.totalorder %s29_s20, %s29_s20 }
  0x11   :  { %p390_p5 = scmp.ne.s32.totalorder %s29_s20, %s389_s21  ;;  %p395_p7 = scmp.lt.s32.totalorder %s389_s21, %s389_s21 }
  0x13   :  { %p396_p8 = por %p395_p7, %p394_p6 }
  0x15   :  { %p397_p9 = pnand %p396_p8, %p390_p5 }
  0x17   :  { %400 = shalt.err (!%p397_p9)
}
  0x18   :  { %34 = dma.hbm_to_vmem [thread:$0]  %s472_s1, 768, %s29_s20, [#allocation7], %s428_s15, %s428_s15, %s429_s16  }
  0x19   :  { %421 = dma.done.wait [#allocation4], 6144  }
  0x1a   :  { %422 = vsyncadd [#allocation4], 4294961152 }
  0x1b   :  { %423 = dma.done.wait [#allocation7], 768  }
  0x1c   :  { %424 = vsyncadd [#allocation7], 4294966528  ;;  %v431_v0 = vmov 0   ;;  %v103_v1 = vld [vmem:[#allocation3 + $0x170] sm:$0xff]  ;;  %v104_v2 = vld [vmem:[#allocation3 + $0x178] sm:$0xff]  ;;  %v432_v57 = vmov 0.0  }
  0x1d   :  { %360 = vset.pattern.permute.xlu0 %v431_v0  ;;  %v102_v3 = vld [vmem:[#allocation3 + $0x168] sm:$0xff]  ;;  %105 = vmatprep.subr.mxu0 %v103_v1  ;;  %v100_v4 = vld [vmem:[#allocation3 + $0x158] sm:$0xff]  ;;  %v101_v5 = vld [vmem:[#allocation3 + $0x160] sm:$0xff]  ;;  %48 = vst [vmem:[#allocation2 + $0x8] sm:$0x1] %v432_v57 }
  0x1e   :  { %316 = vmatprep.subr.mxu1 %v104_v2  ;;  %106 = vmatpush1.xpose.msra.mxu0 %v102_v3  ;;  %v99_v6 = vld [vmem:[#allocation3 + $0x150] sm:$0xff]  ;;  %v97_v7 = vld [vmem:[#allocation3 + $0x140] sm:$0xff]  ;;  %v98_v8 = vld [vmem:[#allocation3 + $0x148] sm:$0xff] }
  0x1f   :  { %317 = vmatpush3.xpose.msra.mxu1 %v104_v2  ;;  %107 = vmatprep.subr.mxu0 %v100_v4  ;;  %v96_v9 = vld [vmem:[#allocation3 + $0x138] sm:$0xff]  ;;  %v94_v10 = vld [vmem:[#allocation3 + $0x128] sm:$0xff]  ;;  %v95_v11 = vld [vmem:[#allocation3 + $0x130] sm:$0xff] }
  0x20   :  { %318 = vmatprep.subr.mxu1 %v101_v5  ;;  %v93_v12 = vld [vmem:[#allocation3 + $0x120] sm:$0xff]  ;;  %v91_v13 = vld [vmem:[#allocation3 + $0x110] sm:$0xff]  ;;  %v92_v14 = vld [vmem:[#allocation3 + $0x118] sm:$0xff] }
  0x21   :  { %v90_v15 = vld [vmem:[#allocation3 + $0x108] sm:$0xff]  ;;  %v88_v16 = vld [vmem:[#allocation3 + $0xf8] sm:$0xff]  ;;  %v89_v17 = vld [vmem:[#allocation3 + $0x100] sm:$0xff] }
  0x22   :  { %108 = vmatpush1.xpose.msra.mxu0 %v99_v6  ;;  %v52_v18 = vld [vmem:[#allocation6 + $0x8] sm:$0xff]  ;;  %v53_v19 = vld [vmem:[#allocation6 + $0x10] sm:$0xff]  ;;  %v85_v22 = vld [vmem:[#allocation3 + $0xe0] sm:$0xff] }
  0x23   :  { %319 = vmatpush3.xpose.msra.mxu1 %v101_v5  ;;  %109 = vmatprep.subr.mxu0 %v97_v7  ;;  %v264_v20 = vld [vmem:[%s473_s2] sm:$0xff]  ;;  %v86_v23 = vld [vmem:[#allocation3 + $0xe8] sm:$0xff]  ;;  %v265_v24 = vld [vmem:[%s473_s2 + $0x8] sm:$0x1]  ;;  %s433_s2 = smov [#allocation8]  }
  0x24   :  { %320 = vmatprep.subr.mxu1 %v98_v8  ;;  %169 = vmatprep.mubr.f32.mxu0 %v52_v18  ;;  %v87_v21 = vld [vmem:[#allocation3 + $0xf0] sm:$0xff]  ;;  %v84_v25 = vld [vmem:[#allocation3 + $0xd8] sm:$0xff]  ;;  %v82_v26 = vld [vmem:[#allocation3 + $0xc8] sm:$0xff]  ;;  %s285_s26 = sshll.u32 %s433_s2, 4  ;;  %s286_s26 = int_to_ptr.vmem [resolvable:$true] %s285_s26 }
  0x25   :  { %348 = vmatprep.mubr.f32.mxu1 %v53_v19  ;;  %268 = vperm.xlu0 %360, %v264_v20   ;;  %v83_v27 = vld [vmem:[#allocation3 + $0xd0] sm:$0xff]  ;;  %v81_v28 = vld [vmem:[#allocation3 + $0xc0] sm:$0xff]  ;;  %v80_v30 = vld [vmem:[#allocation3 + $0xb8] sm:$0xff]  ;;  %s401_s27 = scalar_lea.vmem %s286_s26, 256  ;;  %p406_p11 = scmp.lt.s32.totalorder %s286_s26, %s286_s26 }
  0x26   :  { %110 = vmatpush1.xpose.msra.mxu0 %v96_v9  ;;  %v79_v29 = vld [vmem:[#allocation3 + $0xb0] sm:$0xff]  ;;  %v78_v31 = vld [vmem:[#allocation3 + $0xa8] sm:$0xff]  ;;  %v76_v32 = vld [vmem:[#allocation3 + $0x98] sm:$0xff]  ;;  %p402_p10 = scmp.ne.s32.totalorder %s286_s26, %s401_s27  ;;  %p407_p12 = scmp.lt.s32.totalorder %s401_s27, %s401_s27 }
  0x27   :  { %321 = vmatpush3.xpose.msra.mxu1 %v98_v8  ;;  %111 = vmatprep.subr.mxu0 %v94_v10  ;;  %v77_v33 = vld [vmem:[#allocation3 + $0xa0] sm:$0xff]  ;;  %v75_v34 = vld [vmem:[#allocation3 + $0x90] sm:$0xff]  ;;  %v74_v36 = vld [vmem:[#allocation3 + $0x88] sm:$0xff] }
  0x28   :  { %322 = vmatprep.subr.mxu1 %v95_v11  ;;  %v73_v35 = vld [vmem:[#allocation3 + $0x80] sm:$0xff]  ;;  %v72_v37 = vld [vmem:[#allocation3 + $0x78] sm:$0xff]  ;;  %v70_v38 = vld [vmem:[#allocation3 + $0x68] sm:$0xff]  ;;  %p408_p13 = por %p407_p12, %p406_p11 }
  0x29   :  { %273 = vperm.xlu0 %360, %v265_v24   ;;  %v71_v39 = vld [vmem:[#allocation3 + $0x70] sm:$0xff]  ;;  %v69_v40 = vld [vmem:[#allocation3 + $0x60] sm:$0xff]  ;;  %v68_v42 = vld [vmem:[#allocation3 + $0x58] sm:$0xff] }
  0x2a   :  { %112 = vmatpush1.xpose.msra.mxu0 %v93_v12  ;;  %v67_v41 = vld [vmem:[#allocation3 + $0x50] sm:$0xff]  ;;  %v66_v43 = vld [vmem:[#allocation3 + $0x48] sm:$0xff]  ;;  %v64_v44 = vld [vmem:[#allocation3 + $0x38] sm:$0xff]  ;;  %p409_p0 = pnand %p408_p13, %p402_p10 }
  0x2b   :  { %323 = vmatpush3.xpose.msra.mxu1 %v95_v11  ;;  %113 = vmatprep.subr.mxu0 %v91_v13  ;;  %v65_v45 = vld [vmem:[#allocation3 + $0x40] sm:$0xff]  ;;  %v63_v46 = vld [vmem:[#allocation3 + $0x30] sm:$0xff]  ;;  %v62_v48 = vld [vmem:[#allocation3 + $0x28] sm:$0xff] }
  0x2c   :  { %324 = vmatprep.subr.mxu1 %v92_v14  ;;  %v61_v47 = vld [vmem:[#allocation3 + $0x20] sm:$0xff]  ;;  %v60_v49 = vld [vmem:[#allocation3 + $0x18] sm:$0xff]  ;;  %v58_v50 = vld [vmem:[#allocation3 + $0x8] sm:$0xff] }
  0x2d   :  { %v59_v51 = vld [vmem:[#allocation3 + $0x10] sm:$0xff]  ;;  %v57_v52 = vld [vmem:[#allocation3] sm:$0xff]  ;;  %v56_v54 = vld [vmem:[#allocation6 + $0x28] sm:$0x1] }
  0x2e   :  { %114 = vmatpush1.xpose.msra.mxu0 %v90_v15  ;;  %v51_v53 = vld [vmem:[#allocation6] sm:$0xff]  ;;  %v54_v56 = vld [vmem:[#allocation6 + $0x18] sm:$0x1] }
  0x2f   :  { %325 = vmatpush3.xpose.msra.mxu1 %v92_v14  ;;  %115 = vmatprep.subr.mxu0 %v88_v16  ;;  %v55_v55 = vld [vmem:[#allocation6 + $0x20] sm:$0x1]  ;;  %v50_v63 = vld [vmem:[#allocation2 + $0x8] sm:$0x1] }
  0x30   :  { %326 = vmatprep.subr.mxu1 %v89_v17 }
  0x32   :  { %116 = vmatpush1.xpose.msra.mxu0 %v87_v21 }
  0x33   :  { %327 = vmatpush3.xpose.msra.mxu1 %v89_v17  ;;  %117 = vmatprep.subr.mxu0 %v85_v22 }
  0x34   :  { %328 = vmatprep.subr.mxu1 %v86_v23 }
  0x36   :  { %118 = vmatpush1.xpose.msra.mxu0 %v84_v25 }
  0x37   :  { %329 = vmatpush3.xpose.msra.mxu1 %v86_v23  ;;  %119 = vmatprep.subr.mxu0 %v82_v26 }
  0x38   :  { %330 = vmatprep.subr.mxu1 %v83_v27 }
  0x3a   :  { %120 = vmatpush1.xpose.msra.mxu0 %v81_v28 }
  0x3b   :  { %331 = vmatpush3.xpose.msra.mxu1 %v83_v27  ;;  %121 = vmatprep.subr.mxu0 %v79_v29 }
  0x3c   :  { %332 = vmatprep.subr.mxu1 %v80_v30 }
  0x3e   :  { %122 = vmatpush1.xpose.msra.mxu0 %v78_v31 }
  0x3f   :  { %333 = vmatpush3.xpose.msra.mxu1 %v80_v30  ;;  %123 = vmatprep.subr.mxu0 %v76_v32 }
  0x40   :  { %334 = vmatprep.subr.mxu1 %v77_v33 }
  0x42   :  { %124 = vmatpush1.xpose.msra.mxu0 %v75_v34 }
  0x43   :  { %335 = vmatpush3.xpose.msra.mxu1 %v77_v33  ;;  %125 = vmatprep.subr.mxu0 %v73_v35 }
  0x44   :  { %336 = vmatprep.subr.mxu1 %v74_v36 }
  0x46   :  { %126 = vmatpush1.xpose.msra.mxu0 %v72_v37 }
  0x47   :  { %337 = vmatpush3.xpose.msra.mxu1 %v74_v36  ;;  %127 = vmatprep.subr.mxu0 %v70_v38 }
  0x48   :  { %338 = vmatprep.subr.mxu1 %v71_v39 }
  0x4a   :  { %128 = vmatpush1.xpose.msra.mxu0 %v69_v40 }
  0x4b   :  { %339 = vmatpush3.xpose.msra.mxu1 %v71_v39  ;;  %129 = vmatprep.subr.mxu0 %v67_v41 }
  0x4c   :  { %340 = vmatprep.subr.mxu1 %v68_v42 }
  0x4e   :  { %130 = vmatpush1.xpose.msra.mxu0 %v66_v43 }
  0x4f   :  { %341 = vmatpush3.xpose.msra.mxu1 %v68_v42  ;;  %131 = vmatprep.subr.mxu0 %v64_v44 }
  0x50   :  { %342 = vmatprep.subr.mxu1 %v65_v45 }
  0x52   :  { %132 = vmatpush1.xpose.msra.mxu0 %v63_v46 }
  0x53   :  { %343 = vmatpush3.xpose.msra.mxu1 %v65_v45  ;;  %133 = vmatprep.subr.mxu0 %v61_v47 }
  0x54   :  { %344 = vmatprep.subr.mxu1 %v62_v48 }
  0x56   :  { %134 = vmatpush1.xpose.msra.mxu0 %v60_v49 }
  0x57   :  { %345 = vmatpush3.xpose.msra.mxu1 %v62_v48  ;;  %135 = vmatprep.subr.mxu0 %v58_v50 }
  0x58   :  { %346 = vmatprep.subr.mxu1 %v59_v51 }
  0x5a   :  { %136 = vmatpush1.xpose.msra.mxu0 %v57_v52 }
  0x5b   :  { %347 = vmatpush3.xpose.msra.mxu1 %v59_v51 }
  0x5d   :  { %170 = vmatmul.mubr.f32.vlgmr.msra.gmra.mxu0 %v51_v53 }
  0x5e   :  { %349 = vmatmul.mubr.f32.vlgmr.msra.gmra.mxu1 %v56_v54  ;;  %174 = vmatprep.mubr.f32.mxu0 %v55_v55 }
  0x61   :  { %175 = vmatmul.mubr.f32.gmra.mxu0 %v54_v56 }
  0xa0   :  { %v269_v1 = vpop.permute.xlu0 %268 }
  0xa4   :  { %v274_v6 = vpop.permute.xlu0 %273 }
 0x11d   :  { %v171_v58 = vpop.f32.mrf.mxu0 }
 0x11e   :  { %v350_v59 = vpop.f32.mrf.mxu1 }
 0x11f   :  { %v173_v60 = vpop.f32.mrf.mxu0 }
 0x120   :  { %v246_v61 = vpop.f32.mrf.mxu1 }
 0x121   :  { %v247_v62 = vadd.f32 %v246_v61, %v171_v58  ;;  %v176_v0 = vpop.f32.mrf.mxu0 }
 0x122   :  { %v252_v2 = vadd.f32 %v350_v59, %v176_v0 }
 0x123   :  { %v178_v3 = vpop.f32.mrf.mxu0  ;;  %v276_v5 = vadd.f32 %v269_v1, %v247_v62 }
 0x124   :  { %v256_v4 = vadd.f32 %v252_v2, %v50_v63 }
 0x125   :  { %278 = vst [vmem:[#allocation8] sm:$0xff] %v276_v5 }
 0x126   :  { %258 = vst [vmem:[#allocation2 + $0x8] sm:$0x1] %v256_v4 }
 0x12d   :  { %v263_v7 = vld [vmem:[#allocation2 + $0x8] sm:$0x1] }
 0x12e   :  { %v277_v8 = vadd.f32 %v274_v6, %v263_v7 }
 0x130   :  { %279 = vst [vmem:[#allocation8 + $0x8] sm:$0x1] %v277_v8 }
 0x131   :  { %412 = shalt.err (!%p409_p0)
}
 0x132   :  { %s434_s28 = smov 128   ;;  %s435_s29 = smov 8  }
 0x133   :  { %291 = dma.vmem_to_hbm [thread:$0]  %s286_s26, 256, %s474_s3, [#allocation5], %s434_s28, %s434_s28, %s435_s29  }
 0x134   :  { %425 = dma.done.wait [#allocation5], 256  }
 0x135   :  { %426 = vsyncadd [#allocation5], 4294967040 }
 0x136   :  { %295 = vsyncpa [#allocation4], 1 }
 0x137   :  { %296 = vsyncpa [#allocation7], 1 }
 0x138   :  { %297 = vsyncpa [#allocation5], 1 }

</bundles_post_ra>
